<compile_context>
chip_gen: v5e
topology: v5e:2x2
jax: 0.10.0
libtpu: 0.0.40
codegen_flags: <defaults>
</compile_context>

<pallas_src>
import math
import functools

import jax
import jax.numpy as jnp
from jax import lax
from jax.experimental import pallas as pl
from jax.experimental.pallas import tpu as pltpu


# --------------------------- Fused Pallas kernel -----------------------------

def _fused_mha_kernel(vl_ref, xq_ref, xk_ref, xv_ref,
                      wq_ref, wk_ref, wv_ref, wo_ref,
                      o_ref, *, num_heads, block_b, scale):
    i = pl.program_id(0)

    Bb, Tq, Dq = xq_ref.shape
    _, Tk, Dk = xk_ref.shape
    _, _, Dv = xv_ref.shape
    H = wq_ref.shape[1]
    Dh = H // num_heads

    # Fused Q/K/V projections on the flattened (block_b*T, D) slab — fills MXU
    # rows when block_b > 1 instead of M=Tq=8.
    q = jnp.dot(xq_ref[...].reshape(Bb * Tq, Dq), wq_ref[...],
                preferred_element_type=jnp.float32)
    k = jnp.dot(xk_ref[...].reshape(Bb * Tk, Dk), wk_ref[...],
                preferred_element_type=jnp.float32)
    v = jnp.dot(xv_ref[...].reshape(Bb * Tk, Dv), wv_ref[...],
                preferred_element_type=jnp.float32)
    # Fold 1/sqrt(Dh) into q (cheaper than scaling (Tq, Tk) scores per head).
    q = q * jnp.float32(scale)

    # Column index, hoisted out of all loops.
    col = lax.broadcasted_iota(jnp.int32, (Tq, Tk), 1)
    zero = jnp.float32(0.0)
    neg = jnp.float32(-1e6)   # d2l masked_softmax semantics (-1e6, not -inf)

    for bi in range(block_b):                          # static, small
        # Additive mask bias, built once per batch row from an SMEM scalar.
        valid = vl_ref[i * block_b + bi]
        bias = jnp.where(col < valid, zero, neg)       # (Tq, Tk) f32

        qb = q[bi * Tq:(bi + 1) * Tq, :]
        kb = k[bi * Tk:(bi + 1) * Tk, :]
        vb = v[bi * Tk:(bi + 1) * Tk, :]

        out_acc = jnp.zeros((Tq, H), jnp.float32)
        for h in range(num_heads):                     # static head loop
            sl = slice(h * Dh, (h + 1) * Dh)
            qh, kh, vh = qb[:, sl], kb[:, sl], vb[:, sl]

            # QK^T: contract last axes directly (no explicit k transpose).
            s = lax.dot_general(qh, kh, (((1,), (1,)), ((), ())),
                                preferred_element_type=jnp.float32) + bias
            m = jnp.max(s, axis=-1, keepdims=True)
            e = jnp.exp(s - m)
            denom = jnp.sum(e, axis=-1, keepdims=True)

            # PV first, then exact flash-style normalization of the (Tq, Dh)
            # head output (Tq*Dh divides instead of Tq*Tk multiplies).
            pv = jnp.dot(e, vh, preferred_element_type=jnp.float32)
            pv = pv / denom

            # Fuse the Wo K-reduction into the head loop: no lane-axis concat.
            out_acc = out_acc + jnp.dot(pv, wo_ref[sl, :],
                                        preferred_element_type=jnp.float32)

        o_ref[bi] = out_acc


def multi_head_attention(queries, keys, values, valid_lens, params, num_heads,
                         *, block_b=1):
    """Fused MHA forward: one pallas_call over grid=(batch // block_b,)."""
    Wq, Wk, Wv, Wo = params          # each stored (in_features, out_features)
    B, Tq, Dq = queries.shape
    _, Tk, Dk = keys.shape
    _, _, Dv = values.shape
    H = Wq.shape[1]
    Dh = H // num_heads
    assert B % block_b == 0, "block_b must divide batch"
    grid = (B // block_b,)

    kernel = functools.partial(_fused_mha_kernel,
                               num_heads=num_heads,
                               block_b=block_b,
                               scale=1.0 / math.sqrt(Dh))

    return pl.pallas_call(
        kernel,
        out_shape=jax.ShapeDtypeStruct((B, Tq, H), jnp.float32),
        grid_spec=pltpu.PrefetchScalarGridSpec(
            num_scalar_prefetch=1,            # valid_lens -> SMEM
            grid=grid,
            in_specs=[
                pl.BlockSpec((block_b, Tq, Dq), lambda i, vl: (i, 0, 0)),  # queries
                pl.BlockSpec((block_b, Tk, Dk), lambda i, vl: (i, 0, 0)),  # keys
                pl.BlockSpec((block_b, Tk, Dv), lambda i, vl: (i, 0, 0)),  # values
                pl.BlockSpec((Dq, H), lambda i, vl: (0, 0)),               # Wq (resident)
                pl.BlockSpec((Dk, H), lambda i, vl: (0, 0)),               # Wk
                pl.BlockSpec((Dv, H), lambda i, vl: (0, 0)),               # Wv
                pl.BlockSpec((H, H), lambda i, vl: (0, 0)),                # Wo
            ],
            out_specs=pl.BlockSpec((block_b, Tq, H), lambda i, vl: (i, 0, 0)),
        ),
        compiler_params=pltpu.CompilerParams(
            dimension_semantics=("parallel",)),   # megacore split on v7x
    )(valid_lens.astype(jnp.int32), queries, keys, values, Wq, Wk, Wv, Wo)


# --------------------------- JAX helpers (setup / reference) -----------------

def transpose_qkv(X, num_heads):
    B, T, H = X.shape
    X = X.reshape(B, T, num_heads, -1)
    X = jnp.transpose(X, (0, 2, 1, 3))
    return X.reshape(-1, T, X.shape[3])


def transpose_output(X, num_heads):
    X = X.reshape(-1, num_heads, X.shape[1], X.shape[2])
    X = jnp.transpose(X, (0, 2, 1, 3))
    return X.reshape(X.shape[0], X.shape[1], -1)


def positional_encoding_table(max_len, num_hiddens):
    P = jnp.zeros((1, max_len, num_hiddens), dtype=jnp.float32)
    pos = jnp.arange(max_len, dtype=jnp.float32).reshape(-1, 1)
    div = jnp.power(10000.0,
                    jnp.arange(0, num_hiddens, 2, dtype=jnp.float32) / num_hiddens)
    X = pos / div
    P = P.at[:, :, 0::2].set(jnp.sin(X))
    P = P.at[:, :, 1::2].set(jnp.cos(X))
    return P


def reference_mha(queries, keys, values, valid_lens, params, num_heads):
    """Pure-JAX reference at HIGHEST precision (true f32 reference)."""
    Wq, Wk, Wv, Wo = params
    hp = jax.lax.Precision.HIGHEST
    q = transpose_qkv(jnp.dot(queries, Wq, precision=hp), num_heads)
    k = transpose_qkv(jnp.dot(keys, Wk, precision=hp), num_heads)
    v = transpose_qkv(jnp.dot(values, Wv, precision=hp), num_heads)
    vl = jnp.repeat(valid_lens.astype(jnp.int32), num_heads, axis=0)
    d = q.shape[-1]
    scores = jnp.einsum('bqd,bkd->bqk', q, k, precision=hp) / math.sqrt(d)
    col = jnp.arange(scores.shape[-1])[None, None, :]
    scores = jnp.where(col < vl[:, None, None], scores, -1e6)
    attn = jax.nn.softmax(scores, axis=-1)
    out = jnp.einsum('bqk,bkd->bqd', attn, v, precision=hp)
    return jnp.dot(transpose_output(out, num_heads), Wo, precision=hp)


# --------------------------- Main --------------------------------------------

if __name__ == "__main__":
    num_steps = 8          # sequence length
    num_hiddens = 32       # encoding_dim = key/query/value size = num_hiddens
    num_heads = 4
    batch = 2

    key = jax.random.PRNGKey(0)
    k_q, k_k, k_v, k_o, k_x = jax.random.split(key, 5)

    # nn.Linear(in, out, bias=False) init: U(-1/sqrt(in), 1/sqrt(in)); stored (in, out)
    bound = 1.0 / math.sqrt(num_hiddens)
    def init_w(k):
        return jax.random.uniform(k, (num_hiddens, num_hiddens),
                                  jnp.float32, -bound, bound)
    params = (init_w(k_q), init_w(k_k), init_w(k_v), init_w(k_o))

    # X = PositionalEncoding(encoding_dim, 0)(zeros((1, num_steps, encoding_dim)))
    P = positional_encoding_table(1000, num_hiddens)
    X = P[:, :num_steps, :]                                   # (1, T, H)
    noise = 0.1 * jax.random.normal(k_x, (batch, num_steps, num_hiddens),
                                    jnp.float32)
    X = jnp.broadcast_to(X, (batch, num_steps, num_hiddens)) + noise

    queries, keys_in, values = X, X, X
    valid_lens = jnp.array([3, 6], dtype=jnp.int32)

    out = multi_head_attention(queries, keys_in, values, valid_lens,
                               params, num_heads)
    out = jax.block_until_ready(out)

    ref = reference_mha(queries, keys_in, values, valid_lens, params, num_heads)
    assert out.shape == (batch, num_steps, num_hiddens)
    # Kernel math is exact f32 (no approx reciprocal); reference is HIGHEST-
    # precision f32. Tolerance covers MXU f32 multi-pass rounding.
    assert jnp.allclose(out, ref, atol=2e-3, rtol=2e-3), (
        float(jnp.max(jnp.abs(out - ref))))

    print("KERNEL_OK")
</pallas_src>

<mosaic_0001>
module attributes {stable_mosaic.version = 11 : i64} {
  func.func @_fused_mha_kernel(%arg0: i32, %arg1: memref<2xi32, #tpu.memory_space<smem>>, %arg2: memref<1x8x32xf32, #tpu.memory_space<vmem>>, %arg3: memref<1x8x32xf32, #tpu.memory_space<vmem>>, %arg4: memref<1x8x32xf32, #tpu.memory_space<vmem>>, %arg5: memref<32x32xf32, #tpu.memory_space<vmem>>, %arg6: memref<32x32xf32, #tpu.memory_space<vmem>>, %arg7: memref<32x32xf32, #tpu.memory_space<vmem>>, %arg8: memref<32x32xf32, #tpu.memory_space<vmem>>, %arg9: memref<1x8x32xf32, #tpu.memory_space<vmem>>) attributes {dimension_semantics = [#tpu.dimension_semantics<parallel>], iteration_bounds = array<i64: 2>, scalar_prefetch = 1 : i64, scratch_operands = 0 : i64, tpu.core_type = #tpu.core_type<tc>, window_params = [{transform_indices = @transform_0, window_bounds = array<i64: 1, 8, 32>}, {transform_indices = @transform_1, window_bounds = array<i64: 1, 8, 32>}, {transform_indices = @transform_2, window_bounds = array<i64: 1, 8, 32>}, {pipeline_mode = #tpu.pipeline_mode<synchronous>, transform_indices = @transform_3, window_bounds = array<i64: 32, 32>}, {pipeline_mode = #tpu.pipeline_mode<synchronous>, transform_indices = @transform_4, window_bounds = array<i64: 32, 32>}, {pipeline_mode = #tpu.pipeline_mode<synchronous>, transform_indices = @transform_5, window_bounds = array<i64: 32, 32>}, {pipeline_mode = #tpu.pipeline_mode<synchronous>, transform_indices = @transform_6, window_bounds = array<i64: 32, 32>}, {transform_indices = @transform_7, window_bounds = array<i64: 1, 8, 32>}]} {
    %c0 = arith.constant 0 : index
    %c0_0 = arith.constant 0 : index
    %c0_1 = arith.constant 0 : index
    %0 = vector.load %arg2[%c0, %c0_0, %c0_1] : memref<1x8x32xf32, #tpu.memory_space<vmem>>, vector<1x8x32xf32>
    %1 = vector.shape_cast %0 : vector<1x8x32xf32> to vector<8x32xf32>
    %c0_2 = arith.constant 0 : index
    %c0_3 = arith.constant 0 : index
    %2 = vector.load %arg5[%c0_2, %c0_3] : memref<32x32xf32, #tpu.memory_space<vmem>>, vector<32x32xf32>
    %cst = arith.constant dense<0.000000e+00> : vector<8x32xf32>
    %3 = tpu.matmul %1, %2, %cst {dimension_numbers = #tpu.dot_dimension_numbers<[1], [0], [0], [1], [0, 0, 1, 1], [], []>} : vector<8x32xf32>, vector<32x32xf32>, vector<8x32xf32> -> vector<8x32xf32>
    %c0_4 = arith.constant 0 : index
    %c0_5 = arith.constant 0 : index
    %c0_6 = arith.constant 0 : index
    %4 = vector.load %arg3[%c0_4, %c0_5, %c0_6] : memref<1x8x32xf32, #tpu.memory_space<vmem>>, vector<1x8x32xf32>
    %5 = vector.shape_cast %4 : vector<1x8x32xf32> to vector<8x32xf32>
    %c0_7 = arith.constant 0 : index
    %c0_8 = arith.constant 0 : index
    %6 = vector.load %arg6[%c0_7, %c0_8] : memref<32x32xf32, #tpu.memory_space<vmem>>, vector<32x32xf32>
    %cst_9 = arith.constant dense<0.000000e+00> : vector<8x32xf32>
    %7 = tpu.matmul %5, %6, %cst_9 {dimension_numbers = #tpu.dot_dimension_numbers<[1], [0], [0], [1], [0, 0, 1, 1], [], []>} : vector<8x32xf32>, vector<32x32xf32>, vector<8x32xf32> -> vector<8x32xf32>
    %c0_10 = arith.constant 0 : index
    %c0_11 = arith.constant 0 : index
    %c0_12 = arith.constant 0 : index
    %8 = vector.load %arg4[%c0_10, %c0_11, %c0_12] : memref<1x8x32xf32, #tpu.memory_space<vmem>>, vector<1x8x32xf32>
    %9 = vector.shape_cast %8 : vector<1x8x32xf32> to vector<8x32xf32>
    %c0_13 = arith.constant 0 : index
    %c0_14 = arith.constant 0 : index
    %10 = vector.load %arg7[%c0_13, %c0_14] : memref<32x32xf32, #tpu.memory_space<vmem>>, vector<32x32xf32>
    %cst_15 = arith.constant dense<0.000000e+00> : vector<8x32xf32>
    %11 = tpu.matmul %9, %10, %cst_15 {dimension_numbers = #tpu.dot_dimension_numbers<[1], [0], [0], [1], [0, 0, 1, 1], [], []>} : vector<8x32xf32>, vector<32x32xf32>, vector<8x32xf32> -> vector<8x32xf32>
    %cst_16 = arith.constant 0.353553385 : f32
    %12 = vector.broadcast %cst_16 : f32 to vector<8x32xf32>
    %13 = arith.mulf %3, %12 : vector<8x32xf32>
    %14 = tpu.iota {dimensions = array<i32: 1>} : vector<8x8xi32>
    %c1_i32 = arith.constant 1 : i32
    %15 = arith.muli %arg0, %c1_i32 : i32
    %c0_i32 = arith.constant 0 : i32
    %16 = arith.addi %15, %c0_i32 : i32
    %17 = arith.index_cast %16 : i32 to index
    %18 = memref.load %arg1[%17] : memref<2xi32, #tpu.memory_space<smem>>
    %19 = vector.broadcast %18 : i32 to vector<8x8xi32>
    %20 = arith.cmpi slt, %14, %19 : vector<8x8xi32>
    %cst_17 = arith.constant 0.000000e+00 : f32
    %cst_18 = arith.constant -1.000000e+06 : f32
    %21 = vector.broadcast %cst_17 : f32 to vector<8x8xf32>
    %22 = vector.broadcast %cst_18 : f32 to vector<8x8xf32>
    %23 = arith.select %20, %21, %22 : vector<8x8xi1>, vector<8x8xf32>
    %cst_19 = arith.constant 0.000000e+00 : f32
    %24 = vector.broadcast %cst_19 : f32 to vector<8x32xf32>
    %25 = vector.extract_strided_slice %13 {offsets = [0, 0], sizes = [8, 8], strides = [1, 1]} : vector<8x32xf32> to vector<8x8xf32>
    %26 = vector.extract_strided_slice %7 {offsets = [0, 0], sizes = [8, 8], strides = [1, 1]} : vector<8x32xf32> to vector<8x8xf32>
    %27 = vector.extract_strided_slice %11 {offsets = [0, 0], sizes = [8, 8], strides = [1, 1]} : vector<8x32xf32> to vector<8x8xf32>
    %cst_20 = arith.constant dense<0.000000e+00> : vector<8x8xf32>
    %28 = tpu.matmul %25, %26, %cst_20 {dimension_numbers = #tpu.dot_dimension_numbers<[1], [1], [0], [0], [0, 0, 1, 0], [], []>} : vector<8x8xf32>, vector<8x8xf32>, vector<8x8xf32> -> vector<8x8xf32>
    %29 = arith.addf %28, %23 : vector<8x8xf32>
    %cst_21 = arith.constant dense<0xFF800000> : vector<8xf32>
    %30 = vector.multi_reduction <maximumf>, %29, %cst_21 [1] : vector<8x8xf32> to vector<8xf32>
    %31 = vector.shape_cast %30 : vector<8xf32> to vector<8x1xf32>
    %32 = vector.broadcast %31 : vector<8x1xf32> to vector<8x8xf32>
    %33 = arith.subf %29, %32 : vector<8x8xf32>
    %34 = math.exp %33 : vector<8x8xf32>
    %cst_22 = arith.constant dense<0.000000e+00> : vector<8xf32>
    %35 = vector.multi_reduction <add>, %34, %cst_22 [1] : vector<8x8xf32> to vector<8xf32>
    %36 = vector.shape_cast %35 : vector<8xf32> to vector<8x1xf32>
    %cst_23 = arith.constant dense<0.000000e+00> : vector<8x8xf32>
    %37 = tpu.matmul %34, %27, %cst_23 {dimension_numbers = #tpu.dot_dimension_numbers<[1], [0], [0], [1], [0, 0, 1, 1], [], []>} : vector<8x8xf32>, vector<8x8xf32>, vector<8x8xf32> -> vector<8x8xf32>
    %38 = vector.broadcast %36 : vector<8x1xf32> to vector<8x8xf32>
    %39 = arith.divf %37, %38 : vector<8x8xf32>
    %c0_24 = arith.constant 0 : index
    %c0_25 = arith.constant 0 : index
    %40 = vector.load %arg8[%c0_24, %c0_25] : memref<32x32xf32, #tpu.memory_space<vmem>>, vector<8x32xf32>
    %cst_26 = arith.constant dense<0.000000e+00> : vector<8x32xf32>
    %41 = tpu.matmul %39, %40, %cst_26 {dimension_numbers = #tpu.dot_dimension_numbers<[1], [0], [0], [1], [0, 0, 1, 1], [], []>} : vector<8x8xf32>, vector<8x32xf32>, vector<8x32xf32> -> vector<8x32xf32>
    %42 = arith.addf %24, %41 : vector<8x32xf32>
    %43 = vector.extract_strided_slice %13 {offsets = [0, 8], sizes = [8, 8], strides = [1, 1]} : vector<8x32xf32> to vector<8x8xf32>
    %44 = vector.extract_strided_slice %7 {offsets = [0, 8], sizes = [8, 8], strides = [1, 1]} : vector<8x32xf32> to vector<8x8xf32>
    %45 = vector.extract_strided_slice %11 {offsets = [0, 8], sizes = [8, 8], strides = [1, 1]} : vector<8x32xf32> to vector<8x8xf32>
    %cst_27 = arith.constant dense<0.000000e+00> : vector<8x8xf32>
    %46 = tpu.matmul %43, %44, %cst_27 {dimension_numbers = #tpu.dot_dimension_numbers<[1], [1], [0], [0], [0, 0, 1, 0], [], []>} : vector<8x8xf32>, vector<8x8xf32>, vector<8x8xf32> -> vector<8x8xf32>
    %47 = arith.addf %46, %23 : vector<8x8xf32>
    %cst_28 = arith.constant dense<0xFF800000> : vector<8xf32>
    %48 = vector.multi_reduction <maximumf>, %47, %cst_28 [1] : vector<8x8xf32> to vector<8xf32>
    %49 = vector.shape_cast %48 : vector<8xf32> to vector<8x1xf32>
    %50 = vector.broadcast %49 : vector<8x1xf32> to vector<8x8xf32>
    %51 = arith.subf %47, %50 : vector<8x8xf32>
    %52 = math.exp %51 : vector<8x8xf32>
    %cst_29 = arith.constant dense<0.000000e+00> : vector<8xf32>
    %53 = vector.multi_reduction <add>, %52, %cst_29 [1] : vector<8x8xf32> to vector<8xf32>
    %54 = vector.shape_cast %53 : vector<8xf32> to vector<8x1xf32>
    %cst_30 = arith.constant dense<0.000000e+00> : vector<8x8xf32>
    %55 = tpu.matmul %52, %45, %cst_30 {dimension_numbers = #tpu.dot_dimension_numbers<[1], [0], [0], [1], [0, 0, 1, 1], [], []>} : vector<8x8xf32>, vector<8x8xf32>, vector<8x8xf32> -> vector<8x8xf32>
    %56 = vector.broadcast %54 : vector<8x1xf32> to vector<8x8xf32>
    %57 = arith.divf %55, %56 : vector<8x8xf32>
    %c8 = arith.constant 8 : index
    %c0_31 = arith.constant 0 : index
    %58 = vector.load %arg8[%c8, %c0_31] : memref<32x32xf32, #tpu.memory_space<vmem>>, vector<8x32xf32>
    %cst_32 = arith.constant dense<0.000000e+00> : vector<8x32xf32>
    %59 = tpu.matmul %57, %58, %cst_32 {dimension_numbers = #tpu.dot_dimension_numbers<[1], [0], [0], [1], [0, 0, 1, 1], [], []>} : vector<8x8xf32>, vector<8x32xf32>, vector<8x32xf32> -> vector<8x32xf32>
    %60 = arith.addf %42, %59 : vector<8x32xf32>
    %61 = vector.extract_strided_slice %13 {offsets = [0, 16], sizes = [8, 8], strides = [1, 1]} : vector<8x32xf32> to vector<8x8xf32>
    %62 = vector.extract_strided_slice %7 {offsets = [0, 16], sizes = [8, 8], strides = [1, 1]} : vector<8x32xf32> to vector<8x8xf32>
    %63 = vector.extract_strided_slice %11 {offsets = [0, 16], sizes = [8, 8], strides = [1, 1]} : vector<8x32xf32> to vector<8x8xf32>
    %cst_33 = arith.constant dense<0.000000e+00> : vector<8x8xf32>
    %64 = tpu.matmul %61, %62, %cst_33 {dimension_numbers = #tpu.dot_dimension_numbers<[1], [1], [0], [0], [0, 0, 1, 0], [], []>} : vector<8x8xf32>, vector<8x8xf32>, vector<8x8xf32> -> vector<8x8xf32>
    %65 = arith.addf %64, %23 : vector<8x8xf32>
    %cst_34 = arith.constant dense<0xFF800000> : vector<8xf32>
    %66 = vector.multi_reduction <maximumf>, %65, %cst_34 [1] : vector<8x8xf32> to vector<8xf32>
    %67 = vector.shape_cast %66 : vector<8xf32> to vector<8x1xf32>
    %68 = vector.broadcast %67 : vector<8x1xf32> to vector<8x8xf32>
    %69 = arith.subf %65, %68 : vector<8x8xf32>
    %70 = math.exp %69 : vector<8x8xf32>
    %cst_35 = arith.constant dense<0.000000e+00> : vector<8xf32>
    %71 = vector.multi_reduction <add>, %70, %cst_35 [1] : vector<8x8xf32> to vector<8xf32>
    %72 = vector.shape_cast %71 : vector<8xf32> to vector<8x1xf32>
    %cst_36 = arith.constant dense<0.000000e+00> : vector<8x8xf32>
    %73 = tpu.matmul %70, %63, %cst_36 {dimension_numbers = #tpu.dot_dimension_numbers<[1], [0], [0], [1], [0, 0, 1, 1], [], []>} : vector<8x8xf32>, vector<8x8xf32>, vector<8x8xf32> -> vector<8x8xf32>
    %74 = vector.broadcast %72 : vector<8x1xf32> to vector<8x8xf32>
    %75 = arith.divf %73, %74 : vector<8x8xf32>
    %c16 = arith.constant 16 : index
    %c0_37 = arith.constant 0 : index
    %76 = vector.load %arg8[%c16, %c0_37] : memref<32x32xf32, #tpu.memory_space<vmem>>, vector<8x32xf32>
    %cst_38 = arith.constant dense<0.000000e+00> : vector<8x32xf32>
    %77 = tpu.matmul %75, %76, %cst_38 {dimension_numbers = #tpu.dot_dimension_numbers<[1], [0], [0], [1], [0, 0, 1, 1], [], []>} : vector<8x8xf32>, vector<8x32xf32>, vector<8x32xf32> -> vector<8x32xf32>
    %78 = arith.addf %60, %77 : vector<8x32xf32>
    %79 = vector.extract_strided_slice %13 {offsets = [0, 24], sizes = [8, 8], strides = [1, 1]} : vector<8x32xf32> to vector<8x8xf32>
    %80 = vector.extract_strided_slice %7 {offsets = [0, 24], sizes = [8, 8], strides = [1, 1]} : vector<8x32xf32> to vector<8x8xf32>
    %81 = vector.extract_strided_slice %11 {offsets = [0, 24], sizes = [8, 8], strides = [1, 1]} : vector<8x32xf32> to vector<8x8xf32>
    %cst_39 = arith.constant dense<0.000000e+00> : vector<8x8xf32>
    %82 = tpu.matmul %79, %80, %cst_39 {dimension_numbers = #tpu.dot_dimension_numbers<[1], [1], [0], [0], [0, 0, 1, 0], [], []>} : vector<8x8xf32>, vector<8x8xf32>, vector<8x8xf32> -> vector<8x8xf32>
    %83 = arith.addf %82, %23 : vector<8x8xf32>
    %cst_40 = arith.constant dense<0xFF800000> : vector<8xf32>
    %84 = vector.multi_reduction <maximumf>, %83, %cst_40 [1] : vector<8x8xf32> to vector<8xf32>
    %85 = vector.shape_cast %84 : vector<8xf32> to vector<8x1xf32>
    %86 = vector.broadcast %85 : vector<8x1xf32> to vector<8x8xf32>
    %87 = arith.subf %83, %86 : vector<8x8xf32>
    %88 = math.exp %87 : vector<8x8xf32>
    %cst_41 = arith.constant dense<0.000000e+00> : vector<8xf32>
    %89 = vector.multi_reduction <add>, %88, %cst_41 [1] : vector<8x8xf32> to vector<8xf32>
    %90 = vector.shape_cast %89 : vector<8xf32> to vector<8x1xf32>
    %cst_42 = arith.constant dense<0.000000e+00> : vector<8x8xf32>
    %91 = tpu.matmul %88, %81, %cst_42 {dimension_numbers = #tpu.dot_dimension_numbers<[1], [0], [0], [1], [0, 0, 1, 1], [], []>} : vector<8x8xf32>, vector<8x8xf32>, vector<8x8xf32> -> vector<8x8xf32>
    %92 = vector.broadcast %90 : vector<8x1xf32> to vector<8x8xf32>
    %93 = arith.divf %91, %92 : vector<8x8xf32>
    %c24 = arith.constant 24 : index
    %c0_43 = arith.constant 0 : index
    %94 = vector.load %arg8[%c24, %c0_43] : memref<32x32xf32, #tpu.memory_space<vmem>>, vector<8x32xf32>
    %cst_44 = arith.constant dense<0.000000e+00> : vector<8x32xf32>
    %95 = tpu.matmul %93, %94, %cst_44 {dimension_numbers = #tpu.dot_dimension_numbers<[1], [0], [0], [1], [0, 0, 1, 1], [], []>} : vector<8x8xf32>, vector<8x32xf32>, vector<8x32xf32> -> vector<8x32xf32>
    %96 = arith.addf %78, %95 : vector<8x32xf32>
    %c0_45 = arith.constant 0 : index
    %c0_46 = arith.constant 0 : index
    %c0_47 = arith.constant 0 : index
    %97 = vector.load %arg9[%c0_45, %c0_46, %c0_47] : memref<1x8x32xf32, #tpu.memory_space<vmem>>, vector<1x8x32xf32>
    %98 = vector.shape_cast %97 : vector<1x8x32xf32> to vector<8x32xf32>
    %99 = vector.shape_cast %96 : vector<8x32xf32> to vector<1x8x32xf32>
    tpu.vector_store %arg9[%c0_45, %c0_46, %c0_47], %99 {strides = array<i32>} : memref<1x8x32xf32, #tpu.memory_space<vmem>>, vector<1x8x32xf32>,
    return
  }
  func.func @transform_0(%arg0: i32, %arg1: memref<2xi32, #tpu.memory_space<smem>>) -> (i32, i32, i32) {
    %c0_i32 = arith.constant 0 : i32
    %c0_i32_0 = arith.constant 0 : i32
    %c0_i32_1 = arith.constant 0 : i32
    return %arg0, %c0_i32, %c0_i32_0 : i32, i32, i32
  }
  func.func @transform_1(%arg0: i32, %arg1: memref<2xi32, #tpu.memory_space<smem>>) -> (i32, i32, i32) {
    %c0_i32 = arith.constant 0 : i32
    %c0_i32_0 = arith.constant 0 : i32
    %c0_i32_1 = arith.constant 0 : i32
    return %arg0, %c0_i32, %c0_i32_0 : i32, i32, i32
  }
  func.func @transform_2(%arg0: i32, %arg1: memref<2xi32, #tpu.memory_space<smem>>) -> (i32, i32, i32) {
    %c0_i32 = arith.constant 0 : i32
    %c0_i32_0 = arith.constant 0 : i32
    %c0_i32_1 = arith.constant 0 : i32
    return %arg0, %c0_i32, %c0_i32_0 : i32, i32, i32
  }
  func.func @transform_3(%arg0: i32, %arg1: memref<2xi32, #tpu.memory_space<smem>>) -> (i32, i32) {
    %c0_i32 = arith.constant 0 : i32
    %c0_i32_0 = arith.constant 0 : i32
    %c0_i32_1 = arith.constant 0 : i32
    return %c0_i32, %c0_i32_0 : i32, i32
  }
  func.func @transform_4(%arg0: i32, %arg1: memref<2xi32, #tpu.memory_space<smem>>) -> (i32, i32) {
    %c0_i32 = arith.constant 0 : i32
    %c0_i32_0 = arith.constant 0 : i32
    %c0_i32_1 = arith.constant 0 : i32
    return %c0_i32, %c0_i32_0 : i32, i32
  }
  func.func @transform_5(%arg0: i32, %arg1: memref<2xi32, #tpu.memory_space<smem>>) -> (i32, i32) {
    %c0_i32 = arith.constant 0 : i32
    %c0_i32_0 = arith.constant 0 : i32
    %c0_i32_1 = arith.constant 0 : i32
    return %c0_i32, %c0_i32_0 : i32, i32
  }
  func.func @transform_6(%arg0: i32, %arg1: memref<2xi32, #tpu.memory_space<smem>>) -> (i32, i32) {
    %c0_i32 = arith.constant 0 : i32
    %c0_i32_0 = arith.constant 0 : i32
    %c0_i32_1 = arith.constant 0 : i32
    return %c0_i32, %c0_i32_0 : i32, i32
  }
  func.func @transform_7(%arg0: i32, %arg1: memref<2xi32, #tpu.memory_space<smem>>) -> (i32, i32, i32) {
    %c0_i32 = arith.constant 0 : i32
    %c0_i32_0 = arith.constant 0 : i32
    %c0_i32_1 = arith.constant 0 : i32
    return %arg0, %c0_i32, %c0_i32_0 : i32, i32, i32
  }
}

</mosaic_0001>

<bundles_post_ra>
// kernel: tpu_custom_call.1
= control target key start
LH: loop header
LB: loop body
LE: loop exit
PB: predicated region body
PF: predicated region fallthrough
CT: control target
= control target key end

     0   :  { %s1582_s30 = smov [#allocation3]   ;;  %s1930_s0 = inlined_call_operand.hbm [shape: s32[2], index: 0, kind: input, shape index: {}]   ;;  %s1931_s1 = inlined_call_operand.hbm [shape: f32[2,8,32], index: 1, kind: input, shape index: {}]   ;;  %s1932_s2 = inlined_call_operand.hbm [shape: f32[2,8,32], index: 2, kind: input, shape index: {}]   ;;  %s1933_s3 = inlined_call_operand.hbm [shape: f32[2,8,32], index: 3, kind: input, shape index: {}]   ;;  %s1934_s4 = inlined_call_operand.hbm [shape: f32[32,32], index: 4, kind: input, shape index: {}]   ;;  %s1935_s5 = inlined_call_operand.hbm [shape: f32[32,32], index: 5, kind: input, shape index: {}]   ;;  %s1936_s6 = inlined_call_operand.hbm [shape: f32[32,32], index: 6, kind: input, shape index: {}]   ;;  %s1937_s7 = inlined_call_operand.hbm [shape: f32[32,32], index: 7, kind: input, shape index: {}]   ;;  %s1938_s8 = inlined_call_operand.hbm [shape: f32[2,8,32], index: 8, kind: output, shape index: {}]  }
   0x1   :  { %1947 = sst [smem:[#allocation25_spill]] %s1932_s2  ;;  %s14_s29 = sshll.u32 %s1930_s0, 4  ;;  %s15_s29 = int_to_ptr.hbm [resolvable:$true] %s14_s29 }
   0x2   :  { %1948 = sst [smem:[#allocation26_spill]] %s1934_s4 }
   0x3   :  { %1949 = sst [smem:[#allocation27_spill]] %s1935_s5 }
   0x4   :  { %1950 = sst [smem:[#allocation28_spill]] %s1936_s6 }
   0x5   :  { %1951 = sst [smem:[#allocation29_spill]] %s1937_s7 }
   0x6   :  { %17 = dma.hbm_to_smem %s15_s29, 16, %s1582_s30, [#allocation2] }
   0x7   :  { %1544 = dma.done.wait [#allocation2], 16 }
   0x8   :  { %1545 = vsyncadd [#allocation2], 4294967280 }
   0x9   :  { %20 = sfence }
   0xa   :  { %21 = vsyncpa [#allocation5], 0 }
   0xb   :  { %23 = vsyncpa [#allocation5 + $0x1], 0 }
   0xc   :  { %24 = vsyncpa [#allocation8], 0 }
   0xd   :  { %26 = vsyncpa [#allocation8 + $0x1], 0 }
   0xe   :  { %27 = vsyncpa [#allocation11], 0 }
   0xf   :  { %28 = vsyncpa [#allocation14], 0 }
  0x10   :  { %29 = vsyncpa [#allocation6], 0 }
  0x11   :  { %31 = vsyncpa [#allocation6 + $0x1], 0  ;;  %s1641_s9 = smov 0   ;;  %s1643_s10 = smov 0  }
  0x12   :  { %s1645_s11 = smov 0   ;;  %s1647_s0 = smov 0  }
  0x13 LB: > { %s1952_s4 = sld [smem:[#allocation26_spill]]  ;;  %s1665_s15 = sadd.s32 4294967295, %s1580_s0   ;;  %s1580_s0 = sphi %s1647_s0, %s1973_s0   ;;  %s1576_s11 = sphi %s1645_s11, %s1977_s11   ;;  %s1572_s10 = sphi %s1643_s10, %s1976_s10   ;;  %s1568_s9 = sphi %s1641_s9, %s1975_s9  }
  0x14   : > { %p1114_p0 = scmp.ge.s32.totalorder %s1580_s0, 1  ;;  %p1944_p1 = scmp.eq.s32.totalorder %s1665_s15, 0 }
  0x15   : > { %p230_p2 = scmp.lt.s32.totalorder %s1580_s0, 3  ;;  %s1583_s17 = smov [#allocation10]  }
  0x16   : > { %s243_s18 = sshll.u32 %s1583_s17, 4  ;;  %s1954_s6 = sld [smem:[#allocation28_spill]]  ;;  %s244_s18 = int_to_ptr.vmem [resolvable:$true] %s243_s18 }
  0x17   : > { %p1670_p3 = pnand %p1114_p0, %p230_p2  ;;  %s1584_s23 = smov [#allocation13]  }
  0x18   : > { %s271_s24 = sshll.u32 %s1584_s23, 4  ;;  %s1939_s25 = smov 128   ;;  %s272_s24 = int_to_ptr.vmem [resolvable:$true] %s271_s24 }
  0x19   : > { %s241_s14 = sshll.u32 %s1952_s4, 4  ;;  %p1182_p4 = pneg %p1670_p3  ;;  %s242_s14 = int_to_ptr.hbm [resolvable:$true] %s241_s14 }
  0x1a   : > { %s1941_s26 = smov 8   ;;  %s1113_s27 = sadd.s32 4294967294, %s1580_s0  }
  0x1b   : > { %p1682_p6 = pnand %p1182_p4, %p1944_p1  ;;  %s1698_s28 = sadd.s32 1, %s1580_s0  }
  0x1c   : > { %s269_s21 = sshll.u32 %s1954_s6, 4  ;;  %1956 = sst [smem:[#allocation23_spill]] %s1698_s28  ;;  %s270_s21 = int_to_ptr.hbm [resolvable:$true] %s269_s21 }
  0x1d   : > { %1185 = dma.hbm_to_vmem [thread:$0]  (!%p1682_p6), %s242_s14, 512, %s244_s18, [#allocation11], %s1939_s25, %s1939_s25, %s1941_s26  }
  0x1e   : > { %1191 = dma.hbm_to_vmem [thread:$0]  (!%p1682_p6), %s270_s21, 512, %s272_s24, [#allocation14], %s1939_s25, %s1939_s25, %s1941_s26  }
  0x1f   : > { %s41_s29 = ssub.s32 %s1580_s0, %s1698_s28  ;;  %s44_s30 = sadd.s32 1, %s1576_s11 }
  0x20   : > { %p42_p7 = scmp.eq.s32.totalorder %s41_s29, 0  ;;  %p51_p8 = scmp.ne.s32.totalorder %s1576_s11, %s1572_s10 }
  0x21   : > { %p52_p9 = scmp.eq.s32.totalorder %s1580_s0, 0  ;;  %p57_p10 = scmp.ne.s32.totalorder %s1572_s10, %s1568_s9 }
  0x22   : > { %s1709_s12 = scalar_select %p42_p7, %s1576_s11, %s44_s30  }
  0x23   : > { %p53_p11 = por %p52_p9, %p51_p8  ;;  %p1713_p12 = por %p1944_p1, %p57_p10 }
  0x24   : > { %1957 = sst [smem:[#allocation24_spill]] %s1709_s12  ;;  %p217_p13 = scmp.eq.s32.totalorder %s1665_s15, 1 }
  0x25   : > { %p223_p0 = scmp.eq.s32.totalorder %s1113_s27, 1  ;;  %p1213_p2 = scmp.lt.s32.totalorder %s1580_s0, 2 }
  0x26   : > { %s1943_s14 = sand.u32 1, %s1576_s11   ;;  %p1720_p4 = por %p217_p13, %p51_p8 }
  0x27   : > { %p1724_p5 = por %p223_p0, %p57_p10  ;;  %s1730_s19 = sshll.u32 %s1943_s14, 3 }
  0x28   : > { %s1733_s20 = sshll.u32 %s1580_s0, 3  ;;  %p1735_p7 = pnand %p1213_p2, %p53_p11 }
  0x29   : > { %s318_s23 = sand.u32 1, %s1580_s0   ;;  %s1962_s2 = sld [smem:[#allocation25_spill]] }
  0x2a   : > { %s322_s25 = scalar_lea.vmem [#allocation7], %s1730_s19  ;;  %s1745_s14 = scalar_lea.sflag [#allocation8], %s318_s23 }
  0x2b   : > { %s330_s26 = sshll.u32 %s322_s25, 4  ;;  %p1354_p9 = pneg %p1735_p7  ;;  %s331_s26 = int_to_ptr.vmem [resolvable:$true] %s330_s26 }
  0x2f   : > { %s326_s29 = scalar_lea.hbm %s1962_s2, %s1733_s20  ;;  %s1357_s27 = scalar_lea.hbm %s1962_s2, 16 }
  0x30   : > { %s328_s30 = sshll.u32 %s326_s29, 4  ;;  %s329_s30 = int_to_ptr.hbm [resolvable:$true] %s328_s30 }
  0x31   : > { %s1350_s4 = sshra.s32 %s329_s30, 4  ;;  %s1351_s4 = int_to_ptr.hbm [resolvable:$true] %s1350_s4 }
  0x32   : > { %s1352_s6 = scalar_lea.hbm %s1351_s4, 8  ;;  %p1358_p13 = scmp.lt.s32.totalorder %s1351_s4, %s1962_s2 }
  0x33   : > { %p1353_p8 = scmp.ne.s32.totalorder %s1351_s4, %s1352_s6  ;;  %p1359_p0 = scmp.lt.s32.totalorder %s1357_s27, %s1352_s6 }
  0x35   : > { %p1355_p10 = pnand %p1354_p9, %p1353_p8  ;;  %p1360_p2 = por %p1359_p0, %p1358_p13 }
  0x37   : > { %p1356_p11 = pneg %p1355_p10 }
  0x39   : > { %p1361_p1 = pnand %p1360_p2, %p1356_p11 }
  0x3b   : > { %1364 = shalt.err (!%p1361_p1)
}
  0x3c   : > { %1201 = dma.hbm_to_vmem [thread:$0]  (!%p1735_p7), %s329_s30, 128, %s331_s26, %s1745_s14  }
  0x3d   : > { %s1963_s5 = sld [smem:[#allocation27_spill]]  ;;  %s1587_s24 = smov [#allocation12]  }
  0x3e   : > { %s257_s4 = sshll.u32 %s1587_s24, 4  ;;  %s1964_s7 = sld [smem:[#allocation29_spill]]  ;;  %s258_s4 = int_to_ptr.vmem [resolvable:$true] %s257_s4 }
  0x3f   : > { %s1965_s25 = smov 8   ;;  %s1966_s2 = smov 128  }
  0x40   : > { %s1588_s26 = smov [#allocation15]   ;;  %s307_s24 = scalar_lea.hbm %s1931_s1, %s1733_s20 }
  0x41   : > { %s285_s30 = sshll.u32 %s1588_s26, 4  ;;  %s303_s6 = scalar_lea.vmem [#allocation4], %s1730_s19  ;;  %s286_s30 = int_to_ptr.vmem [resolvable:$true] %s285_s30 }
  0x42   : > { %s311_s27 = sshll.u32 %s303_s6, 4  ;;  %s312_s27 = int_to_ptr.vmem [resolvable:$true] %s311_s27 }
  0x43   : > { %s255_s12 = sshll.u32 %s1963_s5, 4  ;;  %s309_s5 = sshll.u32 %s307_s24, 4  ;;  %s256_s12 = int_to_ptr.hbm [resolvable:$true] %s255_s12  ;;  %s310_s5 = int_to_ptr.hbm [resolvable:$true] %s309_s5 }
  0x44   : > { %s283_s29 = sshll.u32 %s1964_s7, 4  ;;  %s1440_s7 = sshra.s32 %s310_s5, 4  ;;  %s284_s29 = int_to_ptr.hbm [resolvable:$true] %s283_s29  ;;  %s1441_s7 = int_to_ptr.hbm [resolvable:$true] %s1440_s7 }
  0x45   : > { %1188 = dma.hbm_to_vmem [thread:$0]  (!%p1682_p6), %s256_s12, 512, %s258_s4, [#allocation11], %s1966_s2, %s1966_s2, %s1965_s25  }
  0x46   : > { %1194 = dma.hbm_to_vmem [thread:$0]  (!%p1682_p6), %s284_s29, 512, %s286_s30, [#allocation14], %s1966_s2, %s1966_s2, %s1965_s25  }
  0x47   : > { %s1967_s12 = sand.u32 1, %s1576_s11   ;;  %s1442_s26 = scalar_lea.hbm %s1441_s7, 8 }
  0x48   : > { %s300_s4 = scalar_lea.sflag [#allocation5], %s1967_s12  ;;  %p1443_p1 = scmp.ne.s32.totalorder %s1441_s7, %s1442_s26 }
  0x49   : > { %s1447_s29 = scalar_lea.hbm %s1931_s1, 16  ;;  %p1448_p6 = scmp.lt.s32.totalorder %s1441_s7, %s1931_s1 }
  0x4a   : > { %p1445_p8 = pnand %p1443_p1, %p1354_p9  ;;  %p1449_p11 = scmp.lt.s32.totalorder %s1447_s29, %s1442_s26 }
  0x4c   : > { %p1446_p10 = pneg %p1445_p8  ;;  %p1450_p13 = por %p1449_p11, %p1448_p6 }
  0x4e   : > { %p1451_p0 = pnand %p1450_p13, %p1446_p10 }
  0x50   : > { %1454 = shalt.err (!%p1451_p0)
}
  0x51   : > { %1198 = dma.hbm_to_vmem [thread:$0]  (!%p1735_p7), %s310_s5, 128, %s312_s27, %s300_s4  }
  0x52   : > { %s345_s24 = scalar_lea.hbm %s1933_s3, %s1733_s20  ;;  %s341_s6 = scalar_lea.vmem [#allocation9], %s1730_s19 }
  0x53   : > { %s349_s12 = sshll.u32 %s341_s6, 4  ;;  %s347_s2 = sshll.u32 %s345_s24, 4  ;;  %s350_s12 = int_to_ptr.vmem [resolvable:$true] %s349_s12  ;;  %s348_s2 = int_to_ptr.hbm [resolvable:$true] %s347_s2 }
  0x54   : > { %s1470_s7 = sshra.s32 %s348_s2, 4  ;;  %s1477_s5 = scalar_lea.hbm %s1933_s3, 16  ;;  %s1471_s7 = int_to_ptr.hbm [resolvable:$true] %s1470_s7 }
  0x55   : > { %s1472_s26 = scalar_lea.hbm %s1471_s7, 8  ;;  %p1478_p10 = scmp.lt.s32.totalorder %s1471_s7, %s1933_s3 }
  0x56   : > { %p1473_p2 = scmp.ne.s32.totalorder %s1471_s7, %s1472_s26  ;;  %p1479_p6 = scmp.lt.s32.totalorder %s1477_s5, %s1472_s26 }
  0x58   : > { %p1475_p1 = pnand %p1473_p2, %p1354_p9  ;;  %p1480_p11 = por %p1479_p6, %p1478_p10 }
  0x5a   : > { %p1476_p8 = pneg %p1475_p1 }
  0x5c   : > { %p1481_p13 = pnand %p1480_p11, %p1476_p8 }
  0x5e   : > { %1484 = shalt.err (!%p1481_p13)
}
  0x5f   : > { %1204 = dma.hbm_to_vmem [thread:$0]  (!%p1735_p7), %s348_s2, 128, %s350_s12, %s1745_s14  }
  0x60   : > { %358 = sbr.rel (%p1670_p3) target bundleno = 1184 (0x4a0), region = 48  ;;  %s1815_s19 = sand.u32 (!%p1670_p3), 1, %s1572_s10  }
  0x61   : > { %s1818_s20 = sshll.u32 (!%p1670_p3), %s1815_s19, 3  ;;  %s361_s25 = scalar_lea.sflag (!%p1670_p3), [#allocation5], %s1815_s19 }
  0x62   : > { %s364_s30 = scalar_lea.vmem (!%p1670_p3), [#allocation4], %s1818_s20 }
  0x65   : > { %1547 = dma.done.wait (%p1713_p12), %s361_s25, 128  }
  0x66   : > { %1549 = vsyncadd (%p1713_p12), %s361_s25, 4294967168  ;;  %s370_s16 = sand.u32 1, %s1665_s15   ;;  %s374_s21 = scalar_lea.vmem [#allocation7], %s1818_s20 }
  0x67   : > { %s371_s14 = scalar_lea.sflag [#allocation8], %s370_s16 }
  0x68   : > { %1551 = dma.done.wait (%p1713_p12), %s371_s14, 256  }
  0x69   : > { %1553 = vsyncadd (%p1713_p12), %s371_s14, 4294967040  ;;  %s384_s28 = scalar_lea.vmem [#allocation9], %s1818_s20  ;;  %p1968_p3 = scmp.eq.s32.totalorder %s1665_s15, 0 }
  0x6b   : > { %1555 = dma.done.wait (%p1968_p3), [#allocation11], 1024   ;;  %p1969_p7 = pmov %p1968_p3 }
  0x6c   : > { %p1970_p9 = pmov %p1968_p3 }
  0x6d   : > { %1557 = vsyncadd (%p1969_p7), [#allocation11], 4294966272 }
  0x6e   : > { %1559 = dma.done.wait (%p1970_p9), [#allocation14], 1024   ;;  %p1971_p0 = pmov %p1968_p3 }
  0x6f   : > { %v479_v0 = vld [vmem:[#allocation12 + $0x18] sm:$0xff]  ;;  %v478_v2 = vld [vmem:[#allocation12 + $0x10] sm:$0xff]  ;;  %v477_v4 = vld [vmem:[#allocation12 + $0x8] sm:$0xff]  ;;  %vm451_vm0 = vcmask 261120   ;;  %vm538_vm1 = vcmask 64512   ;;  %s1589_s13 = smov 112   ;;  %v532_v21 = vlaneseq }
  0x70   : > { %1561 = vsyncadd (%p1971_p0), [#allocation14], 4294966272  ;;  %v450_v1 = vld [vmem:[#allocation10 + $0x18] sm:$0xff]  ;;  %495 = vmatpush.msra.mxu1 %v479_v0  ;;  %v449_v3 = vld [vmem:[#allocation10 + $0x10] sm:$0xff]  ;;  %s1590_s23 = smov 120   ;;  %s1591_s24 = smov 104  }
  0x71   : > { %467 = vmatpush.msra.mxu0 %v450_v1  ;;  %v448_v5 = vld [vmem:[#allocation10 + $0x8] sm:$0xff]  ;;  %v476_v6 = vld [vmem:[#allocation12] sm:$0xff]  ;;  %v446_v9 = vld [vmem:[%s364_s30] sm:$0xff]  ;;  %s534_s6 = sld [smem:[#allocation3 + %s1665_s15]]  ;;  %v533_v22 = vand.u32 127, %v532_v21  ;;  %s1155_s12 = sshll.u32 %s1665_s15, 3 }
  0x72   : > { %496 = vmatpush.msra.mxu1 %v478_v2  ;;  %v447_v7 = vld [vmem:[#allocation10] sm:$0xff]  ;;  %v507_v13 = vld [vmem:[#allocation13 + $0x18] sm:$0xff]  ;;  %v506_v14 = vld [vmem:[#allocation13 + $0x10] sm:$0xff]  ;;  %v1592_v24 = vmov -1000000.0   ;;  %s957_s26 = scalar_lea.hbm %s1938_s8, %s1155_s12  ;;  %s445_s22 = scalar_lea.vmem [#allocation16], %s1818_s20 }
  0x73   : > { %468 = vmatpush.msra.mxu0 %v449_v3  ;;  %v475_v8 = vld [vmem:[%s374_s21] sm:$0xff]  ;;  %523 = vmatpush.msra.mxu2 %v507_v13  ;;  %v503_v17 = vld [vmem:[%s384_s28] sm:$0xff]  ;;  %s959_s29 = sshll.u32 %s445_s22, 4  ;;  %s961_s5 = sshll.u32 %s957_s26, 4  ;;  %s960_s29 = int_to_ptr.vmem [resolvable:$true] %s959_s29  ;;  %s962_s5 = int_to_ptr.hbm [resolvable:$true] %s961_s5 }
  0x74   : > { %497 = vmatpush.msra.mxu1 %v477_v4  ;;  %v505_v15 = vld [vmem:[#allocation13 + $0x8] sm:$0xff]  ;;  %v504_v16 = vld [vmem:[#allocation13] sm:$0xff]  ;;  %s947_s27 = scalar_lea.sflag [#allocation6], %s1815_s19  ;;  %s1514_s15 = sshra.s32 %s962_s5, 4  ;;  %s1515_s15 = int_to_ptr.hbm [resolvable:$true] %s1514_s15 }
  0x75   : > { %469 = vmatpush.msra.mxu0 %v448_v5  ;;  %524 = vmatpush.msra.mxu2 %v506_v14  ;;  %v612_v30 = vld [vmem:[#allocation15] sm:$0xff]  ;;  %v692_v63 = vld [vmem:[#allocation15 + $0x8] sm:$0xff]  ;;  %s1516_s4 = scalar_lea.hbm %s1515_s15, 8  ;;  %s1520_s20 = scalar_lea.hbm %s1938_s8, 16 }
  0x76   : > { %498 = vmatpush.msra.mxu1 %v476_v6  ;;  %p1517_p12 = scmp.ne.s32.totalorder %s1515_s15, %s1516_s4  ;;  %p1521_p8 = scmp.lt.s32.totalorder %s1515_s15, %s1938_s8 }
  0x77   : > { %470 = vmatpush.msra.mxu0 %v447_v7  ;;  %1136 = vmatmul.msk.f32.vlgmr.msra.gmra.mxu1 %vm451_vm0, %v475_v8  ;;  %v535_v23 = vstv %s534_s6  ;;  %p1522_p10 = scmp.lt.s32.totalorder %s1520_s20, %s1516_s4 }
  0x78   : > { %1135 = vmatmul.msk.f32.vlgmr.msra.gmra.mxu0 %vm451_vm0, %v446_v9  ;;  %525 = vmatpush.msra.mxu2 %v505_v15  ;;  %vm536_vm2 = vcmp.lt.s32.totalorder %v533_v22, %v535_v23  ;;  %p1518_p2 = pnand %p1517_p12, %p1720_p4 }
  0x79   : > { %v1857_v25 = vsel %vm536_vm2, 0.0, %v1592_v24  ;;  %p1523_p6 = por %p1522_p10, %p1521_p8 }
  0x7a   : > { %526 = vmatpush.msra.mxu2 %v504_v16  ;;  %p1519_p1 = pneg %p1518_p2 }
  0x7b   : > { %1137 = vmatmul.msk.f32.vlgmr.msra.gmra.mxu2 %vm451_vm0, %v503_v17 }
  0x7c   : > { %711 = vmatpush.msrb.mxu2 %v692_v63  ;;  %p1524_p11 = pnand %p1523_p6, %p1519_p1 }
  0xf4   : > { %v500_v10 = vpop.f32.mrf.mxu1 }
  0xf5   : > { %v472_v11 = vpop.f32.mrf.mxu0  ;;  %741 = vrot.lane.b32.xlu2 %v500_v10, %s1589_s13  ;;  %615 = vrot.lane.b32.xlu1 %v500_v10, %s1590_s23 }
  0xf6   : > { %v531_v12 = vmul.f32 0.35355338, %v472_v11  ;;  %1138 = vmatpush.xpose.msk.msra.mxu3 %vm538_vm1, %v500_v10 }
  0xf9   : > { %1139 = vmatmul.msk.f32.vlgmr.msra.gmra.mxu3 %vm538_vm1, %v531_v12 }
  0xfd   : > { %844 = vrot.lane.b32.xlu2 %v500_v10, %s1591_s24  ;;  %613 = vrot.lane.b32.xlu1 %v531_v12, %s1590_s23 }
  0xfe   : > { %v1861_v29 = vpop.f32.mrf.mxu2 }
  0xff   : > { %592 = vmatpush.msrb.mxu3 %v1861_v29 }
 0x101   : > { %734 = vmatpush.msra.mxu3 %v612_v30  ;;  %v817_v30 = vld [vmem:[#allocation15 + $0x10] sm:$0xff] }
 0x102   : > { %836 = vmatpush.msra.mxu2 %v817_v30 }
 0x105   : > { %842 = vrot.lane.b32.xlu1 %v531_v12, %s1591_s24 }
 0x14f   : > { %v742_v19 = vpop.permute.xlu2 %741 }
 0x157   : > { %v845_v38 = vpop.permute.xlu2 %844 }
 0x167   : > { %v616_v18 = vpop.permute.xlu1 %615 }
 0x168   : > { %1141 = vmatpush.xpose.msk.msrb.mxu0 %vm538_vm1, %v616_v18 }
 0x16c   : > { %1146 = vmatpush.xpose.msk.msra.mxu0 %vm538_vm1, %v742_v19 }
 0x16f   : > { %v614_v20 = vpop.permute.xlu1 %613 }
 0x170   : > { %1142 = vmatmul.msk.f32.vlgmr.msrb.gmra.mxu0 %vm538_vm1, %v614_v20 }
 0x177   : > { %v843_v59 = vpop.permute.xlu1 %842 }
 0x17c   : > { %v562_v26 = vpop.f32.mrf.mxu3 }
 0x17d   : > { %v563_v27 = vadd.f32 %v562_v26, %v1857_v25 }
 0x17f   : > { %v565_v28 = vsel %vm538_vm1, %v563_v27, -inf }
 0x180   : > { %566 = vmax.xlane.f32.xlu0 %v565_v28 }
 0x1ed   : > { %v638_v31 = vpop.f32.mrf.mxu0 }
 0x1ee   : > { %v639_v32 = vadd.f32 %v638_v31, %v1857_v25 }
 0x1f0   : > { %v641_v33 = vsel %vm538_vm1, %v639_v32, -inf }
 0x1f1   : > { %642 = vmax.xlane.f32.xlu2 %v641_v33 }
 0x1f3   : > { %v567_v34 = vpop.xlane.xlu0 %566 }
 0x1f4   : > { %v568_v35 = vsub.f32 %v563_v27, %v567_v34 }
 0x1f6   : > { %v569_v36 = vmul.f32 1.442695, %v568_v35 }
 0x1f8   : > { %1262 = vpow2.f32 %v569_v36 }
 0x1fe   : > { %v1263_v37 = vpop.eup %1262 }
 0x1ff   : > { %1140 = vmatmul.msk.f32.vlgmr.msrb.gmra.mxu3 %vm538_vm1, %v1263_v37  ;;  %v571_v39 = vsel %vm538_vm1, %v1263_v37, 0.0 }
 0x200   : > { %1150 = vmatpush.xpose.msk.msrb.mxu3 %vm538_vm1, %v845_v38  ;;  %572 = vadd.xlane.f32.xlu0 %v571_v39 }
 0x209   : > { %776 = vrot.lane.b32.xlu2 %v1861_v29, %s1589_s13 }
 0x214   : > { %739 = vrot.lane.b32.xlu0 %v531_v12, %s1589_s13 }
 0x21c   : > { %651 = vrot.lane.b32.xlu0 %v1861_v29, %s1590_s23 }
 0x264   : > { %v643_v40 = vpop.xlane.xlu2 %642 }
 0x265   : > { %v644_v41 = vsub.f32 %v639_v32, %v643_v40  ;;  %v920_v32 = vld [vmem:[#allocation15 + $0x18] sm:$0xff] }
 0x267   : > { %v645_v42 = vmul.f32 1.442695, %v644_v41 }
 0x269   : > { %1264 = vpow2.f32 %v645_v42 }
 0x26c   : > { %v777_v61 = vpop.permute.xlu2 %776 }
 0x26f   : > { %v1265_v43 = vpop.eup %1264 }
 0x270   : > { %v647_v44 = vsel %vm538_vm1, %v1265_v43, 0.0 }
 0x271   : > { %648 = vadd.xlane.f32.xlu2 %v647_v44 }
 0x273   : > { %v573_v45 = vpop.xlane.xlu0 %572 }
 0x274   : > { %1266 = vrcp.f32 %v573_v45  ;;  %v608_v49 = vand.u32 2147483648, %v573_v45  ;;  %v606_v51 = vand.u32 2147483647, %v573_v45  ;;  %vm602_vm4 = vweird.f32 %v573_v45 }
 0x276   : > { %v609_v53 = vor.u32 1.1754944e-38, %v608_v49  ;;  %vm607_vm6 = vcmp.eq.f32.partialorder %v606_v51, 8.507059e+37 }
 0x27a   : > { %v1267_v46 = vpop.eup %1266 }
 0x27b   : > { %v598_v47 = vmul.f32 %v1267_v46, %v573_v45  ;;  %vm603_vm3 = vweird.f32 %v1267_v46 }
 0x27c   : > { %vm604_vm5 = vmor %vm602_vm4, %vm603_vm3 }
 0x27d   : > { %v599_v48 = vsub.f32 1.0, %v598_v47 }
 0x27f   : > { %v600_v50 = vmul.f32 %v1267_v46, %v599_v48 }
 0x281   : > { %v601_v52 = vadd.f32 %v1267_v46, %v600_v50 }
 0x282   : > { %v594_v55 = vpop.f32.mrf.mxu3 }
 0x283   : > { %v605_v54 = vsel %vm604_vm5, %v1267_v46, %v601_v52 }
 0x284   : > { %v610_v56 = vsel %vm607_vm6, %v609_v53, %v605_v54 }
 0x285   : > { %v611_v57 = vmul.f32 %v610_v56, %v594_v55 }
 0x286   : > { %v740_v58 = vpop.permute.xlu0 %739 }
 0x287   : > { %1145 = vmatmul.msk.f32.vlgmr.msra.gmra.mxu3 %vm538_vm1, %v611_v57  ;;  %1147 = vmatmul.msk.f32.vlgmr.msra.gmra.mxu0 %vm538_vm1, %v740_v58 }
 0x28e   : > { %v652_v60 = vpop.permute.xlu0 %651 }
 0x28f   : > { %672 = vmatpush.msrb.mxu1 %v652_v60  ;;  %1151 = vmatmul.msk.f32.vlgmr.msrb.gmra.mxu3 %vm538_vm1, %v843_v59 }
 0x290   : > { %1143 = vmatmul.msk.f32.vlgmr.msrb.gmra.mxu1 %vm538_vm1, %v1265_v43 }
 0x291   : > { %797 = vmatpush.msra.mxu1 %v777_v61 }
 0x293   : > { %939 = vmatpush.msrb.mxu1 %v920_v32 }
 0x2e4   : > { %v649_v62 = vpop.xlane.xlu2 %648 }
 0x2e5   : > { %1268 = vrcp.f32 %v649_v62  ;;  %v688_v7 = vand.u32 2147483648, %v649_v62  ;;  %vm682_vm8 = vweird.f32 %v649_v62  ;;  %v686_v9 = vand.u32 2147483647, %v649_v62 }
 0x2e7   : > { %v689_v12 = vor.u32 1.1754944e-38, %v688_v7  ;;  %vm687_vm10 = vcmp.eq.f32.partialorder %v686_v9, 8.507059e+37 }
 0x2eb   : > { %v1269_v0 = vpop.eup %1268 }
 0x2ec   : > { %v678_v1 = vmul.f32 %v1269_v0, %v649_v62  ;;  %vm683_vm7 = vweird.f32 %v1269_v0 }
 0x2ed   : > { %vm684_vm9 = vmor %vm682_vm8, %vm683_vm7 }
 0x2ee   : > { %v679_v2 = vsub.f32 1.0, %v678_v1 }
 0x2f0   : > { %v680_v3 = vmul.f32 %v1269_v0, %v679_v2 }
 0x2f2   : > { %v681_v6 = vadd.f32 %v1269_v0, %v680_v3 }
 0x2f4   : > { %v685_v11 = vsel %vm684_vm9, %v1269_v0, %v681_v6 }
 0x2f5   : > { %v690_v14 = vsel %vm687_vm10, %v689_v12, %v685_v11 }
 0x304   : > { %v764_v4 = vpop.f32.mrf.mxu0 }
 0x305   : > { %v765_v5 = vadd.f32 %v764_v4, %v1857_v25 }
 0x307   : > { %v767_v8 = vsel %vm538_vm1, %v765_v5, -inf }
 0x308   : > { %768 = vmax.xlane.f32.xlu1 %v767_v8 }
 0x30a   : > { %v1881_v10 = vpop.f32.mrf.mxu3 }
 0x30d   : > { %v674_v13 = vpop.f32.mrf.mxu1 }
 0x30e   : > { %v691_v15 = vmul.f32 %v690_v14, %v674_v13 }
 0x310   : > { %1144 = vmatmul.msk.f32.vlgmr.msrb.gmra.mxu2 %vm538_vm1, %v691_v15 }
 0x312   : > { %v867_v16 = vpop.f32.mrf.mxu3 }
 0x313   : > { %v868_v17 = vadd.f32 %v867_v16, %v1857_v25 }
 0x315   : > { %v870_v18 = vsel %vm538_vm1, %v868_v17, -inf }
 0x316   : > { %871 = vmax.xlane.f32.xlu0 %v870_v18 }
 0x321   : > { %879 = vrot.lane.b32.xlu1 %v1861_v29, %s1591_s24 }
 0x37b   : > { %v769_v19 = vpop.xlane.xlu1 %768 }
 0x37c   : > { %v770_v20 = vsub.f32 %v765_v5, %v769_v19 }
 0x37e   : > { %v771_v21 = vmul.f32 1.442695, %v770_v20 }
 0x380   : > { %1270 = vpow2.f32 %v771_v21 }
 0x386   : > { %v1271_v22 = vpop.eup %1270 }
 0x387   : > { %1148 = vmatmul.msk.f32.vlgmr.msra.gmra.mxu1 %vm538_vm1, %v1271_v22  ;;  %v773_v23 = vsel %vm538_vm1, %v1271_v22, 0.0 }
 0x388   : > { %774 = vadd.xlane.f32.xlu0 %v773_v23 }
 0x389   : > { %v872_v24 = vpop.xlane.xlu0 %871 }
 0x38a   : > { %v873_v26 = vsub.f32 %v868_v17, %v872_v24 }
 0x38c   : > { %v874_v27 = vmul.f32 1.442695, %v873_v26 }
 0x38e   : > { %1272 = vpow2.f32 %v874_v27 }
 0x393   : > { %v880_v25 = vpop.permute.xlu1 %879  ;;  %v713_v58 = vpop.f32.mrf.mxu2 }
 0x394   : > { %v1273_v28 = vpop.eup %1272  ;;  %900 = vmatpush.msrb.mxu0 %v880_v25  ;;  %v737_v60 = vadd.f32 %v1881_v10, %v713_v58 }
 0x395   : > { %1152 = vmatmul.msk.f32.vlgmr.msrb.gmra.mxu0 %vm538_vm1, %v1273_v28  ;;  %v876_v29 = vsel %vm538_vm1, %v1273_v28, 0.0 }
 0x396   : > { %877 = vadd.xlane.f32.xlu1 %v876_v29 }
 0x3fb   : > { %v775_v31 = vpop.xlane.xlu0 %774 }
 0x3fc   : > { %1274 = vrcp.f32 %v775_v31  ;;  %v813_v36 = vand.u32 2147483648, %v775_v31  ;;  %v811_v38 = vand.u32 2147483647, %v775_v31  ;;  %vm807_vm12 = vweird.f32 %v775_v31 }
 0x3fe   : > { %v814_v41 = vor.u32 1.1754944e-38, %v813_v36  ;;  %vm812_vm14 = vcmp.eq.f32.partialorder %v811_v38, 8.507059e+37 }
 0x402   : > { %v1275_v33 = vpop.eup %1274 }
 0x403   : > { %v803_v34 = vmul.f32 %v1275_v33, %v775_v31  ;;  %vm808_vm11 = vweird.f32 %v1275_v33 }
 0x404   : > { %vm809_vm13 = vmor %vm807_vm12, %vm808_vm11  ;;  %v799_v43 = vpop.f32.mrf.mxu1 }
 0x405   : > { %v804_v35 = vsub.f32 1.0, %v803_v34 }
 0x407   : > { %v805_v37 = vmul.f32 %v1275_v33, %v804_v35 }
 0x409   : > { %v806_v39 = vadd.f32 %v1275_v33, %v805_v37  ;;  %v878_v40 = vpop.xlane.xlu1 %877 }
 0x40a   : > { %1276 = vrcp.f32 %v878_v40  ;;  %v916_v49 = vand.u32 2147483648, %v878_v40  ;;  %v914_v51 = vand.u32 2147483647, %v878_v40  ;;  %vm910_vm2 = vweird.f32 %v878_v40 }
 0x40b   : > { %v810_v42 = vsel %vm809_vm13, %v1275_v33, %v806_v39 }
 0x40c   : > { %v815_v44 = vsel %vm812_vm14, %v814_v41, %v810_v42  ;;  %v917_v53 = vor.u32 1.1754944e-38, %v916_v49  ;;  %vm915_vm4 = vcmp.eq.f32.partialorder %v914_v51, 8.507059e+37 }
 0x40d   : > { %v816_v45 = vmul.f32 %v815_v44, %v799_v43 }
 0x40f   : > { %1149 = vmatmul.msk.f32.vlgmr.msra.gmra.mxu2 %vm538_vm1, %v816_v45 }
 0x410   : > { %v1277_v46 = vpop.eup %1276 }
 0x411   : > { %v906_v47 = vmul.f32 %v1277_v46, %v878_v40  ;;  %vm911_vm15 = vweird.f32 %v1277_v46 }
 0x412   : > { %vm912_vm3 = vmor %vm910_vm2, %vm911_vm15  ;;  %v902_v55 = vpop.f32.mrf.mxu0 }
 0x413   : > { %v907_v48 = vsub.f32 1.0, %v906_v47 }
 0x415   : > { %v908_v50 = vmul.f32 %v1277_v46, %v907_v48 }
 0x417   : > { %v909_v52 = vadd.f32 %v1277_v46, %v908_v50 }
 0x419   : > { %v913_v54 = vsel %vm912_vm3, %v1277_v46, %v909_v52 }
 0x41a   : > { %v918_v56 = vsel %vm915_vm4, %v917_v53, %v913_v54 }
 0x41b   : > { %v919_v57 = vmul.f32 %v918_v56, %v902_v55 }
 0x41d   : > { %1153 = vmatmul.msk.f32.vlgmr.msrb.gmra.mxu1 %vm538_vm1, %v919_v57 }
 0x492   : > { %v838_v59 = vpop.f32.mrf.mxu2 }
 0x493   : > { %v841_v61 = vadd.f32 %v838_v59, %v737_v60 }
 0x49a   : > { %v941_v62 = vpop.f32.mrf.mxu1 }
 0x49b   : > { %v944_v63 = vadd.f32 %v941_v62, %v841_v61 }
 0x49d   : > { %945 = vst.msk [vmem:[%s445_s22] sm:$0xff] %vm451_vm0, %v944_v63 }
 0x49e   : > { %1527 = shalt.err (!%p1524_p11)
}
 0x49f   : > { %1180 = dma.vmem_to_hbm [thread:$0]  (%p1720_p4), %s960_s29, 128, %s962_s5, %s947_s27  }
 0x4a0 PF: > { %s973_s19 = sand.u32 1, %s1568_s9   ;;  %p1972_p13 = scmp.ge.s32.totalorder %s1580_s0, 2 }
 0x4a1   : > { %s974_s21 = scalar_lea.sflag [#allocation6], %s973_s19 }
 0x4a2   : > { %p1206_p3 = pnand %p1972_p13, %p1724_p5 }
 0x4a4   : > { %p1207_p7 = pneg %p1206_p3 }
 0x4a6   : > { %1563 = dma.done.wait (%p1207_p7), %s974_s21, 128  }
 0x4a7   : > { %1565 = vsyncadd (%p1207_p7), %s974_s21, 4294967168  ;;  %s1973_s0 = sld [smem:[#allocation23_spill]]  ;;  %s1975_s9 = smov %s1572_s10 }
 0x4a8   : > { %s1974_s28 = sld [smem:[#allocation24_spill]]  ;;  %s1976_s10 = smov %s1576_s11 }
 0x4ad   : > { %p34_p9 = scmp.ge.s32.totalorder %s1973_s0, 4  }
 0x4ae   : > { %s1977_s11 = smov %s1974_s28 }
 0x4af   :  { %36 = sbr.rel (!%p34_p9) target bundleno = 19 (0x13), region = 133 }
 0x4b4   :  { %980 = vsyncpa [#allocation5], 1 }
 0x4b5   :  { %982 = vsyncpa [#allocation5 + $0x1], 1 }
 0x4b6   :  { %983 = vsyncpa [#allocation8], 1 }
 0x4b7   :  { %985 = vsyncpa [#allocation8 + $0x1], 1 }
 0x4b8   :  { %986 = vsyncpa [#allocation11], 1 }
 0x4b9   :  { %987 = vsyncpa [#allocation14], 1 }
 0x4ba   :  { %988 = vsyncpa [#allocation6], 1 }
 0x4bb   :  { %990 = vsyncpa [#allocation6 + $0x1], 1 }

</bundles_post_ra>
